<compile_context>
chip_gen: v7x
topology: tpu7x:2x2x1
jax: 0.10.0
libtpu: 0.0.40
codegen_flags: <defaults>
</compile_context>

<pallas_src>
import functools

import jax
import jax.numpy as jnp
from jax.experimental import pallas as pl
from jax.experimental.pallas import tpu as pltpu

_LANE = 128      # lane width: output padded to a multiple of this for unmasked vst
_SUBLANE = 8     # sublane granularity for batch tiling
_MAX_TILE_B = 512  # rows per grid step if B is scaled up (fits v7x VMEM budget)


def sentiment_encoder_kernel(ids_ref, fused_ref, out_ref):
    """ids_ref: (TB, 1) int32; fused_ref: (V, O_pad) f32; out_ref: (TB, O_pad) f32."""
    ids = ids_ref[...]                                    # (TB, 1) int32
    tbl = fused_ref[...]                                  # (V, O_pad) f32
    tb = ids.shape[0]
    v_rows = tbl.shape[0]
    o_pad = tbl.shape[1]

    # Hoist the 1-lane -> 128-lane broadcast of ids out of the select loop
    # (JAX does not CSE broadcast_in_dim; doing it inside would emit it V-1x).
    ids_b = jnp.broadcast_to(ids, (tb, o_pad))            # (TB, O_pad) int32

    row0 = tbl[0:1, :]                                    # padding row (=> tanh(bias))
    acc = jnp.broadcast_to(row0, (tb, o_pad))             # base: row 0 / out-of-range ids

    # Independent masked terms: mask_v * (row_v - row0). Exactly one mask is hot
    # per element (or none for padding), so summing the terms == row lookup.
    partials = [
        (ids_b == v).astype(jnp.float32) * (tbl[v:v + 1, :] - row0)
        for v in range(1, v_rows)
    ]
    # Pairwise tree reduction -> log-depth instead of a serial chain on one vreg.
    while len(partials) > 1:
        nxt = [partials[i] + partials[i + 1] for i in range(0, len(partials) - 1, 2)]
        if len(partials) % 2:
            nxt.append(partials[-1])
        partials = nxt
    if partials:
        acc = acc + partials[0]

    out_ref[...] = jnp.tanh(acc)                          # EUP tanh, lane-dense unmasked store


def precompute_fused_table(embed_table, linear_weight, linear_bias, lane=_LANE):
    """Fold Embedding + Linear into one (V, O_pad) table.

    Call ONCE at parameter-load / checkpoint time (hoisted out of the hot path).
    Row 0 of `embed_table` is the padding row (zeros), so fused row 0 == bias and
    tanh(row 0) reproduces the padded-index output of the unfused module.
    """
    o_dim = linear_weight.shape[0]
    o_pad = pl.cdiv(o_dim, lane) * lane
    fused = (jnp.asarray(embed_table, jnp.float32)
             @ jnp.asarray(linear_weight, jnp.float32).T
             + jnp.asarray(linear_bias, jnp.float32)[None, :])       # (V, O)
    fused = jnp.pad(fused, ((0, 0), (0, o_pad - o_dim)))             # (V, O_pad)
    return fused, o_dim


@functools.partial(jax.jit, static_argnames=("out_dim",))
def sentiment_encoder_apply(sentiment, fused_table, *, out_dim):
    """Hot path: row lookup + tanh via the Pallas kernel.

    sentiment: (B,) int ids in [0, V-1]; fused_table: (V, O_pad) f32 (precomputed).
    Returns (B, out_dim) f32.
    """
    b = sentiment.shape[0]
    v_rows, o_pad = fused_table.shape

    # Batch tiling: parallel grid over row tiles (degenerates to grid=(1,) at B=16).
    tile_b = min(_MAX_TILE_B, pl.cdiv(b, _SUBLANE) * _SUBLANE)
    grid_b = pl.cdiv(b, tile_b)
    b_pad = grid_b * tile_b

    ids2d = sentiment.astype(jnp.int32).reshape(b, 1)
    if b_pad != b:
        ids2d = jnp.pad(ids2d, ((0, b_pad - b), (0, 0)))

    cost = pl.CostEstimate(
        flops=4 * b_pad * v_rows * o_pad,            # a handful of VPU ops per row
        transcendentals=b_pad * o_pad,               # tanh
        bytes_accessed=4 * (b_pad * 1 + grid_b * v_rows * o_pad + b_pad * o_pad),
    )

    out_padded = pl.pallas_call(
        sentiment_encoder_kernel,
        out_shape=jax.ShapeDtypeStruct((b_pad, o_pad), jnp.float32),
        grid=(grid_b,),
        in_specs=[
            pl.BlockSpec((tile_b, 1), lambda i: (i, 0)),       # ids tile
            pl.BlockSpec((v_rows, o_pad), lambda i: (0, 0)),   # fused table (resident)
        ],
        out_specs=pl.BlockSpec((tile_b, o_pad), lambda i: (i, 0)),
        compiler_params=pltpu.CompilerParams(
            dimension_semantics=("parallel",)),                # 2-TC sharding on v7x
        cost_estimate=cost,
    )(ids2d, fused_table)

    return out_padded[:b, :out_dim]


def sentiment_encoder(sentiment, embed_table, linear_weight, linear_bias):
    """Convenience wrapper (precompute + apply). Prefer caching the fused table."""
    fused, o_dim = precompute_fused_table(embed_table, linear_weight, linear_bias)
    return sentiment_encoder_apply(sentiment, fused, out_dim=o_dim)


if __name__ == "__main__":
    # Module hyper-params (small, consistent with __init__).
    num_sent_classes = 5
    sent_embed_dim = 32
    sent_output_dim = 16
    vocab = num_sent_classes + 1             # +1 for padding index 0
    batch = 16

    key = jax.random.PRNGKey(0)
    k_emb, k_w, k_b, k_ids = jax.random.split(key, 4)

    # Deterministic synthetic parameters.
    embed_table = jax.random.normal(k_emb, (vocab, sent_embed_dim), jnp.float32) * 0.1
    embed_table = embed_table.at[0].set(0.0)                  # padding_idx=0
    linear_weight = jax.random.normal(k_w, (sent_output_dim, sent_embed_dim), jnp.float32) * 0.1
    linear_bias = jax.random.normal(k_b, (sent_output_dim,), jnp.float32) * 0.1

    # Sentiment class ids in [0, num_sent_classes] (0 = padding).
    sentiment = jax.random.randint(k_ids, (batch,), 0, vocab, dtype=jnp.int32)

    # Precompute the fused table ONCE (parameter-load time), then run the hot path.
    fused_table, out_dim = precompute_fused_table(embed_table, linear_weight, linear_bias)
    fused_table = jax.block_until_ready(fused_table)

    out = sentiment_encoder_apply(sentiment, fused_table, out_dim=out_dim)
    out = jax.block_until_ready(out)

    # Pure-JAX reference check (unfused path).
    ref = jnp.tanh(embed_table[sentiment] @ linear_weight.T + linear_bias)
    assert out.shape == (batch, sent_output_dim)
    assert jnp.allclose(out, ref, atol=1e-5, rtol=1e-5)

    print("KERNEL_OK")
</pallas_src>

<mosaic_0001>
module attributes {stable_mosaic.version = 11 : i64} {
  func.func @sentiment_encoder_kernel(%arg0: i32, %arg1: memref<16x1xi32, #tpu.memory_space<vmem>>, %arg2: memref<6x128xf32, #tpu.memory_space<vmem>>, %arg3: memref<16x128xf32, #tpu.memory_space<vmem>>) attributes {dimension_semantics = [#tpu.dimension_semantics<parallel>], iteration_bounds = array<i64: 1>, scalar_prefetch = 0 : i64, scratch_operands = 0 : i64, tpu.core_type = #tpu.core_type<tc>, window_params = [{transform_indices = @transform_0, window_bounds = array<i64: 16, 1>}, {pipeline_mode = #tpu.pipeline_mode<synchronous>, transform_indices = @transform_1, window_bounds = array<i64: 6, 128>}, {transform_indices = @transform_2, window_bounds = array<i64: 16, 128>}]} {
    %c0 = arith.constant 0 : index
    %c0_0 = arith.constant 0 : index
    %0 = vector.load %arg1[%c0, %c0_0] : memref<16x1xi32, #tpu.memory_space<vmem>>, vector<16x1xi32>
    %c0_1 = arith.constant 0 : index
    %c0_2 = arith.constant 0 : index
    %1 = vector.load %arg2[%c0_1, %c0_2] : memref<6x128xf32, #tpu.memory_space<vmem>>, vector<6x128xf32>
    %2 = vector.shape_cast %0 : vector<16x1xi32> to vector<16x1xi32>
    %3 = vector.broadcast %2 : vector<16x1xi32> to vector<16x128xi32>
    %4 = vector.extract_strided_slice %1 {offsets = [0, 0], sizes = [1, 128], strides = [1, 1]} : vector<6x128xf32> to vector<1x128xf32>
    %5 = vector.shape_cast %4 : vector<1x128xf32> to vector<1x128xf32>
    %6 = vector.broadcast %5 : vector<1x128xf32> to vector<16x128xf32>
    %c1_i32 = arith.constant 1 : i32
    %7 = vector.broadcast %c1_i32 : i32 to vector<16x128xi32>
    %8 = arith.cmpi eq, %3, %7 : vector<16x128xi32>
    %9 = arith.extui %8 : vector<16x128xi1> to vector<16x128xi32>
    %10 = arith.sitofp %9 : vector<16x128xi32> to vector<16x128xf32>
    %11 = vector.extract_strided_slice %1 {offsets = [1, 0], sizes = [1, 128], strides = [1, 1]} : vector<6x128xf32> to vector<1x128xf32>
    %12 = arith.subf %11, %4 : vector<1x128xf32>
    %13 = vector.broadcast %12 : vector<1x128xf32> to vector<16x128xf32>
    %14 = arith.mulf %10, %13 : vector<16x128xf32>
    %c2_i32 = arith.constant 2 : i32
    %15 = vector.broadcast %c2_i32 : i32 to vector<16x128xi32>
    %16 = arith.cmpi eq, %3, %15 : vector<16x128xi32>
    %17 = arith.extui %16 : vector<16x128xi1> to vector<16x128xi32>
    %18 = arith.sitofp %17 : vector<16x128xi32> to vector<16x128xf32>
    %19 = vector.extract_strided_slice %1 {offsets = [2, 0], sizes = [1, 128], strides = [1, 1]} : vector<6x128xf32> to vector<1x128xf32>
    %20 = arith.subf %19, %4 : vector<1x128xf32>
    %21 = vector.broadcast %20 : vector<1x128xf32> to vector<16x128xf32>
    %22 = arith.mulf %18, %21 : vector<16x128xf32>
    %c3_i32 = arith.constant 3 : i32
    %23 = vector.broadcast %c3_i32 : i32 to vector<16x128xi32>
    %24 = arith.cmpi eq, %3, %23 : vector<16x128xi32>
    %25 = arith.extui %24 : vector<16x128xi1> to vector<16x128xi32>
    %26 = arith.sitofp %25 : vector<16x128xi32> to vector<16x128xf32>
    %27 = vector.extract_strided_slice %1 {offsets = [3, 0], sizes = [1, 128], strides = [1, 1]} : vector<6x128xf32> to vector<1x128xf32>
    %28 = arith.subf %27, %4 : vector<1x128xf32>
    %29 = vector.broadcast %28 : vector<1x128xf32> to vector<16x128xf32>
    %30 = arith.mulf %26, %29 : vector<16x128xf32>
    %c4_i32 = arith.constant 4 : i32
    %31 = vector.broadcast %c4_i32 : i32 to vector<16x128xi32>
    %32 = arith.cmpi eq, %3, %31 : vector<16x128xi32>
    %33 = arith.extui %32 : vector<16x128xi1> to vector<16x128xi32>
    %34 = arith.sitofp %33 : vector<16x128xi32> to vector<16x128xf32>
    %35 = vector.extract_strided_slice %1 {offsets = [4, 0], sizes = [1, 128], strides = [1, 1]} : vector<6x128xf32> to vector<1x128xf32>
    %36 = arith.subf %35, %4 : vector<1x128xf32>
    %37 = vector.broadcast %36 : vector<1x128xf32> to vector<16x128xf32>
    %38 = arith.mulf %34, %37 : vector<16x128xf32>
    %c5_i32 = arith.constant 5 : i32
    %39 = vector.broadcast %c5_i32 : i32 to vector<16x128xi32>
    %40 = arith.cmpi eq, %3, %39 : vector<16x128xi32>
    %41 = arith.extui %40 : vector<16x128xi1> to vector<16x128xi32>
    %42 = arith.sitofp %41 : vector<16x128xi32> to vector<16x128xf32>
    %43 = vector.extract_strided_slice %1 {offsets = [5, 0], sizes = [1, 128], strides = [1, 1]} : vector<6x128xf32> to vector<1x128xf32>
    %44 = arith.subf %43, %4 : vector<1x128xf32>
    %45 = vector.broadcast %44 : vector<1x128xf32> to vector<16x128xf32>
    %46 = arith.mulf %42, %45 : vector<16x128xf32>
    %47 = arith.addf %14, %22 : vector<16x128xf32>
    %48 = arith.addf %30, %38 : vector<16x128xf32>
    %49 = arith.addf %47, %48 : vector<16x128xf32>
    %50 = arith.addf %49, %46 : vector<16x128xf32>
    %51 = arith.addf %6, %50 : vector<16x128xf32>
    %52 = math.tanh %51 : vector<16x128xf32>
    %c0_3 = arith.constant 0 : index
    %c0_4 = arith.constant 0 : index
    %53 = vector.load %arg3[%c0_3, %c0_4] : memref<16x128xf32, #tpu.memory_space<vmem>>, vector<16x128xf32>
    tpu.vector_store %arg3[%c0_3, %c0_4], %52 {strides = array<i32>} : memref<16x128xf32, #tpu.memory_space<vmem>>, vector<16x128xf32>,
    return
  }
  func.func @transform_0(%arg0: i32) -> (i32, i32) {
    %c0_i32 = arith.constant 0 : i32
    %c0_i32_0 = arith.constant 0 : i32
    return %arg0, %c0_i32 : i32, i32
  }
  func.func @transform_1(%arg0: i32) -> (i32, i32) {
    %c0_i32 = arith.constant 0 : i32
    %c0_i32_0 = arith.constant 0 : i32
    %c0_i32_1 = arith.constant 0 : i32
    return %c0_i32, %c0_i32_0 : i32, i32
  }
  func.func @transform_2(%arg0: i32) -> (i32, i32) {
    %c0_i32 = arith.constant 0 : i32
    %c0_i32_0 = arith.constant 0 : i32
    return %arg0, %c0_i32 : i32, i32
  }
}

</mosaic_0001>

<bundles_post_ra>
// kernel: sentiment_encoder_apply.1
= control target key start
LH: loop header
LB: loop body
LE: loop exit
PB: predicated region body
PF: predicated region fallthrough
CT: control target
= control target key end

     0   :  { %v175_v1 = vmov 0   ;;  %s216_s0 = inlined_call_operand.vmem [shape: s32[16,1], index: 0, kind: input, shape index: {}]   ;;  %s217_s1 = inlined_call_operand.vmem [shape: f32[6,128], index: 1, kind: input, shape index: {}]   ;;  %s218_s2 = inlined_call_operand.hbm [shape: f32[16,128], index: 2, kind: output, shape index: {}]  }
   0x1   :  { %v12_v0 = vld [vmem:[%s216_s0] sm:$0xff]  ;;  %146 = vset.pattern.permute.xlu0 %v175_v1 }
   0x2   :  { %7 = vsyncpa [#allocation3], 0  ;;  %16 = vperm.xlu0 %146, %v12_v0   ;;  %v13_v2 = vld [vmem:[%s216_s0 + $0x8] sm:$0xff]  ;;  %v14_v3 = vld [vmem:[%s217_s1] sm:$0x3f]  ;;  %v21_v4 = vlaneseq  ;;  %v176_v28 = vmov 0.0  }
   0x3   :  { %v32_v5 = vrot.slane %v14_v3, 7  ;;  %v47_v6 = vrot.slane %v14_v3, 6  ;;  %v62_v8 = vrot.slane %v14_v3, 5  ;;  %v77_v9 = vrot.slane %v14_v3, 4  ;;  %s177_s0 = smov [#allocation2]  }
   0x4   :  { %v22_v7 = vshrl.u32 %v21_v4, 7  ;;  %v92_v10 = vrot.slane %v14_v3, 3  ;;  %s120_s1 = sshll.u32 %s177_s0, 4  ;;  %s121_s1 = int_to_ptr.vmem [resolvable:$true] %s120_s1 }
   0x5   :  { %v34_v11 = vsub.f32 %v14_v3, %v32_v5  ;;  %v49_v12 = vsub.f32 %v14_v3, %v47_v6  ;;  %v64_v15 = vsub.f32 %v14_v3, %v62_v8  ;;  %v79_v17 = vsub.f32 %v14_v3, %v77_v9  ;;  %s151_s15 = scalar_lea.vmem %s121_s1, 256  ;;  %p156_p1 = scmp.lt.s32.totalorder %s121_s1, %s121_s1 }
   0x6   :  { %19 = vperm.xlu0 %146, %v13_v2   ;;  %v37_v13 = vsub.s32 1, %v22_v7  ;;  %v52_v14 = vsub.s32 2, %v22_v7  ;;  %v67_v16 = vsub.s32 3, %v22_v7  ;;  %v82_v18 = vsub.s32 4, %v22_v7  ;;  %p152_p0 = scmp.ne.s32.totalorder %s121_s1, %s151_s15  ;;  %p157_p2 = scmp.lt.s32.totalorder %s151_s15, %s151_s15 }
   0x7   :  { %v94_v19 = vsub.f32 %v14_v3, %v92_v10  ;;  %v97_v20 = vsub.s32 5, %v22_v7  ;;  %v23_v27 = vsub.s32 0, %v22_v7 }
   0x8   :  { %v38_v21 = vrot.slane %v34_v11, %v37_v13  ;;  %v53_v22 = vrot.slane %v49_v12, %v52_v14  ;;  %v68_v23 = vrot.slane %v64_v15, %v67_v16  ;;  %v83_v25 = vrot.slane %v79_v17, %v82_v18  ;;  %p158_p3 = por %p157_p2, %p156_p1 }
   0x9   :  { %v98_v26 = vrot.slane %v94_v19, %v97_v20  ;;  %v24_v39 = vrot.slane %v14_v3, %v23_v27 }
   0xa   :  { %p159_p4 = pnand %p158_p3, %p152_p0 }
  0x81   :  { %v17_v24 = vpop.permute.xlu0 %16 }
  0x82   :  { %vm25_vm0 = vcmp.eq.s32.totalorder %v17_v24, 1  ;;  %vm41_vm1 = vcmp.eq.s32.totalorder %v17_v24, 2  ;;  %vm56_vm2 = vcmp.eq.s32.totalorder %v17_v24, 3  ;;  %vm71_vm3 = vcmp.eq.s32.totalorder %v17_v24, 4 }
  0x83   :  { %v131_v29 = vsel %vm25_vm0, 1.0, %v176_v28  ;;  %v133_v30 = vsel %vm41_vm1, 1.0, %v176_v28  ;;  %v135_v31 = vsel %vm56_vm2, 1.0, %v176_v28  ;;  %v137_v32 = vsel %vm71_vm3, 1.0, %v176_v28 }
  0x84   :  { %vm86_vm4 = vcmp.eq.s32.totalorder %v17_v24, 5  ;;  %v39_v33 = vmul.f32 %v131_v29, %v38_v21  ;;  %v54_v34 = vmul.f32 %v133_v30, %v53_v22  ;;  %v69_v35 = vmul.f32 %v135_v31, %v68_v23 }
  0x85   :  { %v139_v36 = vsel %vm86_vm4, 1.0, %v176_v28  ;;  %v84_v37 = vmul.f32 %v137_v32, %v83_v25  ;;  %v20_v38 = vpop.permute.xlu0 %19 }
  0x86   :  { %v99_v40 = vmul.f32 %v139_v36, %v98_v26  ;;  %v101_v41 = vadd.f32 %v54_v34, %v39_v33  ;;  %vm26_vm5 = vcmp.eq.s32.totalorder %v20_v38, 1  ;;  %vm42_vm6 = vcmp.eq.s32.totalorder %v20_v38, 2 }
  0x87   :  { %v103_v42 = vadd.f32 %v84_v37, %v69_v35  ;;  %v132_v43 = vsel %vm26_vm5, 1.0, %v176_v28  ;;  %v134_v44 = vsel %vm42_vm6, 1.0, %v176_v28  ;;  %vm57_vm7 = vcmp.eq.s32.totalorder %v20_v38, 3 }
  0x88   :  { %v40_v45 = vmul.f32 %v132_v43, %v38_v21  ;;  %v55_v46 = vmul.f32 %v134_v44, %v53_v22  ;;  %v136_v47 = vsel %vm57_vm7, 1.0, %v176_v28  ;;  %vm72_vm8 = vcmp.eq.s32.totalorder %v20_v38, 4 }
  0x89   :  { %v70_v48 = vmul.f32 %v136_v47, %v68_v23  ;;  %v138_v49 = vsel %vm72_vm8, 1.0, %v176_v28  ;;  %vm87_vm9 = vcmp.eq.s32.totalorder %v20_v38, 5  ;;  %v105_v50 = vadd.f32 %v103_v42, %v101_v41 }
  0x8a   :  { %v85_v51 = vmul.f32 %v138_v49, %v83_v25  ;;  %v102_v52 = vadd.f32 %v55_v46, %v40_v45  ;;  %v140_v53 = vsel %vm87_vm9, 1.0, %v176_v28 }
  0x8b   :  { %v107_v54 = vadd.f32 %v105_v50, %v99_v40  ;;  %v100_v57 = vmul.f32 %v140_v53, %v98_v26 }
  0x8c   :  { %v104_v55 = vadd.f32 %v85_v51, %v70_v48 }
  0x8d   :  { %v109_v56 = vadd.f32 %v107_v54, %v24_v39 }
  0x8e   :  { %v106_v58 = vadd.f32 %v104_v55, %v102_v52 }
  0x8f   :  { %147 = vtanh.f32 %v109_v56 }
  0x90   :  { %v108_v59 = vadd.f32 %v106_v58, %v100_v57 }
  0x92   :  { %v110_v60 = vadd.f32 %v108_v59, %v24_v39 }
  0x94   :  { %149 = vtanh.f32 %v110_v60 }
  0x99   :  { %v148_v61 = vpop.eup %147 }
  0x9a   :  { %113 = vst [vmem:[#allocation2] sm:$0xff] %v148_v61 }
  0x9e   :  { %v150_v62 = vpop.eup %149 }
  0x9f   :  { %114 = vst [vmem:[#allocation2 + $0x8] sm:$0xff] %v150_v62 }
  0xa0   :  { %162 = shalt.err (!%p159_p4)
}
  0xa1   :  { %s163_s18 = scalar_lea.hbm %s218_s2, 256 }
  0xa2   :  { %p164_p5 = scmp.ne.s32.totalorder %s218_s2, %s163_s18  ;;  %p167_p6 = scmp.lt.u32.totalorder %s163_s18, %s218_s2 }
  0xa4   :  { %p169_p7 = pnand %p167_p6, %p164_p5 }
  0xa6   :  { %172 = shalt.err (!%p169_p7)
}
  0xa7   :  { %s178_s23 = smov 128   ;;  %s179_s24 = smov 8  }
  0xa8   :  { %126 = dma.vmem_to_hbm [thread:$0]  %s121_s1, 256, %s218_s2, [#allocation3], %s178_s23, %s178_s23, %s179_s24  }
  0xa9   :  { %173 = dma.done.wait [#allocation3], 256  }
  0xaa   :  { %174 = vsyncadd [#allocation3], 4294967040 }
  0xab   :  { %130 = vsyncpa [#allocation3], 1 }

</bundles_post_ra>
